<compile_context>
chip_gen: v6e
topology: v6e:2x2x1
jax: 0.10.0
libtpu: 0.0.40
codegen_flags: <defaults>
</compile_context>

<pallas_src>
import numpy as np
import jax
import jax.numpy as jnp
from jax.experimental import pallas as pl
from jax.experimental.pallas import tpu as pltpu


# --------------------------------------------------------------------------- #
# Kernels
# --------------------------------------------------------------------------- #
def _linear_kernel_direct(x_ref, wt_ref, b_ref, o_ref):
    """f32-output path: o_ref (f32) doubles as the accumulator.

    x_ref : (tm, tk)   input tile (compute_dtype)
    wt_ref: (tk, tn)   weight tile, already transposed to (K, N)
    b_ref : (1,  tn)   f32 bias row tile
    o_ref : (tm, tn)   f32 output tile, resident across the K grid axis
    """
    k = pl.program_id(2)

    @pl.when(k == 0)
    def _():
        o_ref[...] = jnp.broadcast_to(b_ref[...], o_ref.shape)

    o_ref[...] += jnp.dot(x_ref[...], wt_ref[...],
                          preferred_element_type=jnp.float32)


def _linear_kernel_scratch(x_ref, wt_ref, b_ref, o_ref, acc_ref):
    """Non-f32-output path: accumulate in an f32 VMEM scratch, cast at the end."""
    k = pl.program_id(2)

    @pl.when(k == 0)
    def _():
        acc_ref[...] = jnp.broadcast_to(b_ref[...], acc_ref.shape)

    acc_ref[...] += jnp.dot(x_ref[...], wt_ref[...],
                            preferred_element_type=jnp.float32)

    @pl.when(k == pl.num_programs(2) - 1)
    def _():
        o_ref[...] = acc_ref[...].astype(o_ref.dtype)


# --------------------------------------------------------------------------- #
# Host-side helpers
# --------------------------------------------------------------------------- #
def _round_up(x, m):
    return (x + m - 1) // m * m


def _pad2(a, rows, cols):
    r, c = a.shape
    if r == rows and c == cols:
        return a
    return jnp.pad(a, ((0, rows - r), (0, cols - c)))


def _pick_lane_tile(padded, cap):
    """Tile for a lane-aligned dim (padded is a multiple of 128).

    Prefer an exact divisor of `padded` (no extra padding); otherwise pad up
    to a multiple of `cap`.  Returns (tile, new_padded).
    """
    if padded <= cap:
        return padded, padded
    t = cap
    while t >= 256:
        if padded % t == 0:
            return t, padded
        t -= 128
    return cap, _round_up(padded, cap)


def linear_reg_forward_wt(x, wt, b, *, compute_dtype=jnp.bfloat16):
    """y = x @ wt + b, with wt already in (in_size, out_size) = (K, N) layout.

    compute_dtype: dtype of the MXU operands (default bfloat16 — v6e/v7x peak);
                   accumulation and bias add are always f32.
    """
    M, K = x.shape
    K2, N = wt.shape
    assert K == K2, "in_size mismatch"
    assert b.shape == (N,), "bias size mismatch"
    out_dtype = x.dtype
    if compute_dtype is None:
        compute_dtype = x.dtype
    cbytes = np.dtype(compute_dtype).itemsize
    obytes = np.dtype(out_dtype).itemsize

    # ---- tile selection -----------------------------------------------------
    # Batch (sublane) dim: quantum 16 for 2-byte operands (full sublane packing),
    # else 8; capped at 512.
    sub = 16 if cbytes == 2 else 8
    Mp = _round_up(M, sub)
    tm = min(Mp, 512)
    Mp = _round_up(Mp, tm)

    # Lane dims: multiples of 128 (lane-dense stores, (8,128) rule, MXU-friendly).
    Np = _round_up(N, 128)
    tn, Np = _pick_lane_tile(Np, 1024)
    Kp = _round_up(K, 128)
    tk, Kp = _pick_lane_tile(Kp, 2048)

    # v7x 2-TC occupancy: if both parallel axes collapsed to 1, split N in two.
    if Mp == tm and Np == tn and Np % 256 == 0:
        tn = Np // 2

    grid = (Mp // tm, Np // tn, Kp // tk)

    # ---- operand prep (zero padding is exact for matmul + bias) -------------
    xp = _pad2(x.astype(compute_dtype), Mp, Kp)
    wtp = _pad2(wt.astype(compute_dtype), Kp, Np)
    bp = _pad2(b.astype(jnp.float32).reshape(1, N), 1, Np)

    use_scratch = np.dtype(out_dtype) != np.dtype(jnp.float32)

    # ---- VMEM budget (real element sizes, double-buffered tiles) ------------
    footprint = (2 * tm * tk * cbytes        # x tiles (double-buffered)
                 + 2 * tk * tn * cbytes      # weight tiles
                 + 2 * tn * 4                # bias tiles (f32)
                 + 2 * tm * tn * obytes)     # output tiles
    if use_scratch:
        footprint += tm * tn * 4             # resident f32 accumulator
    vmem_limit = int(min(48 * 1024 * 1024,
                         max(16 * 1024 * 1024, int(footprint * 1.25))))

    cost = pl.CostEstimate(
        flops=2 * Mp * Np * Kp,
        transcendentals=0,
        bytes_accessed=cbytes * (Mp * Kp + Kp * Np) + 4 * Np + obytes * Mp * Np,
    )

    in_specs = [
        pl.BlockSpec((tm, tk), lambda i, j, k: (i, k)),   # x tile
        pl.BlockSpec((tk, tn), lambda i, j, k: (k, j)),   # w^T tile (K, N layout)
        pl.BlockSpec((1, tn), lambda i, j, k: (0, j)),    # bias row tile
    ]
    out_spec = pl.BlockSpec((tm, tn), lambda i, j, k: (i, j))

    if use_scratch:
        kernel = _linear_kernel_scratch
        scratch_shapes = [pltpu.VMEM((tm, tn), jnp.float32)]
    else:
        kernel = _linear_kernel_direct
        scratch_shapes = []

    out = pl.pallas_call(
        kernel,
        out_shape=jax.ShapeDtypeStruct((Mp, Np), out_dtype),
        grid_spec=pltpu.PrefetchScalarGridSpec(
            num_scalar_prefetch=0,
            grid=grid,
            in_specs=in_specs,
            out_specs=out_spec,
            scratch_shapes=scratch_shapes,
        ),
        compiler_params=pltpu.CompilerParams(
            dimension_semantics=("parallel", "parallel", "arbitrary"),
            vmem_limit_bytes=vmem_limit,
        ),
        cost_estimate=cost,
    )(xp, wtp, bp)

    if (Mp, Np) != (M, N):
        out = out[:M, :N]
    return out


def linear_reg_forward(x, w, b, *, compute_dtype=jnp.bfloat16):
    """y = x @ w.T + b with w in PyTorch (out_size, in_size) layout."""
    return linear_reg_forward_wt(x, jnp.asarray(w).T, b, compute_dtype=compute_dtype)


class LinearReg:
    """Functional mirror of the PyTorch Linear_reg module."""

    def __init__(self, w, b):
        # Pre-transpose ONCE to (in_size, out_size) so every forward feeds the
        # MXU a canonical (tm,tk) x (tk,tn) contraction.
        self.wt = jnp.asarray(w).T          # (in_size, out_size)
        self.b = jnp.asarray(b)             # (out_size,)

    def __call__(self, x, *, compute_dtype=jnp.bfloat16):
        return linear_reg_forward_wt(x, self.wt, self.b, compute_dtype=compute_dtype)


if __name__ == "__main__":
    # Small shapes consistent with Linear_reg(in_size, out_size)
    batch, in_size, out_size = 8, 32, 16

    key = jax.random.PRNGKey(0)
    kx, kw, kb = jax.random.split(key, 3)

    x = jax.random.normal(kx, (batch, in_size), dtype=jnp.float32)
    # Deterministic init mimicking nn.Linear's uniform(-1/sqrt(in), 1/sqrt(in))
    bound = 1.0 / (in_size ** 0.5)
    w = jax.random.uniform(kw, (out_size, in_size), dtype=jnp.float32,
                           minval=-bound, maxval=bound)
    b = jax.random.uniform(kb, (out_size,), dtype=jnp.float32,
                           minval=-bound, maxval=bound)

    model = LinearReg(w, b)
    y_ref = x @ w.T + b

    # Default path: bf16 MXU operands, f32 accumulation (loose tolerance).
    y_bf16 = jax.block_until_ready(model(x))
    assert y_bf16.shape == (batch, out_size)
    assert jnp.allclose(y_bf16, y_ref, atol=3e-2, rtol=3e-2)

    # Full-precision path: f32 operands (tight tolerance vs. the f32 reference).
    y_f32 = jax.block_until_ready(model(x, compute_dtype=jnp.float32))
    assert y_f32.shape == (batch, out_size)
    assert jnp.allclose(y_f32, y_ref, atol=1e-5, rtol=1e-5)

    print("KERNEL_OK")
</pallas_src>

<mosaic_0001>
module attributes {stable_mosaic.version = 11 : i64} {
  func.func @_linear_kernel_direct(%arg0: i32, %arg1: i32, %arg2: i32, %arg3: memref<16x128xbf16, #tpu.memory_space<vmem>>, %arg4: memref<128x128xbf16, #tpu.memory_space<vmem>>, %arg5: memref<1x128xf32, #tpu.memory_space<vmem>>, %arg6: memref<16x128xf32, #tpu.memory_space<vmem>>) attributes {dimension_semantics = [#tpu.dimension_semantics<parallel>, #tpu.dimension_semantics<parallel>, #tpu.dimension_semantics<arbitrary>], iteration_bounds = array<i64: 1, 1, 1>, scalar_prefetch = 0 : i64, scratch_operands = 0 : i64, tpu.core_type = #tpu.core_type<tc>, window_params = [{transform_indices = @transform_0, window_bounds = array<i64: 16, 128>}, {transform_indices = @transform_1, window_bounds = array<i64: 128, 128>}, {transform_indices = @transform_2, window_bounds = array<i64: 1, 128>}, {transform_indices = @transform_3, window_bounds = array<i64: 16, 128>}]} {
    %c0_i32 = arith.constant 0 : i32
    %0 = arith.cmpi eq, %arg2, %c0_i32 : i32
    %1 = arith.extui %0 : i1 to i32
    %c0_i32_0 = arith.constant 0 : i32
    %2 = arith.cmpi ne, %1, %c0_i32_0 : i32
    scf.if %2 {
      %c0_8 = arith.constant 0 : index
      %c0_9 = arith.constant 0 : index
      %9 = vector.load %arg5[%c0_8, %c0_9] : memref<1x128xf32, #tpu.memory_space<vmem>>, vector<1x128xf32>
      %10 = vector.shape_cast %9 : vector<1x128xf32> to vector<1x128xf32>
      %11 = vector.broadcast %10 : vector<1x128xf32> to vector<16x128xf32>
      %c0_10 = arith.constant 0 : index
      %c0_11 = arith.constant 0 : index
      %12 = vector.load %arg6[%c0_10, %c0_11] : memref<16x128xf32, #tpu.memory_space<vmem>>, vector<16x128xf32>
      tpu.vector_store %arg6[%c0_10, %c0_11], %11 {strides = array<i32>} : memref<16x128xf32, #tpu.memory_space<vmem>>, vector<16x128xf32>,
    } else {
    }
    %c0 = arith.constant 0 : index
    %c0_1 = arith.constant 0 : index
    %3 = vector.load %arg6[%c0, %c0_1] : memref<16x128xf32, #tpu.memory_space<vmem>>, vector<16x128xf32>
    %c0_2 = arith.constant 0 : index
    %c0_3 = arith.constant 0 : index
    %4 = vector.load %arg3[%c0_2, %c0_3] : memref<16x128xbf16, #tpu.memory_space<vmem>>, vector<16x128xbf16>
    %c0_4 = arith.constant 0 : index
    %c0_5 = arith.constant 0 : index
    %5 = vector.load %arg4[%c0_4, %c0_5] : memref<128x128xbf16, #tpu.memory_space<vmem>>, vector<128x128xbf16>
    %cst = arith.constant dense<0.000000e+00> : vector<16x128xf32>
    %6 = tpu.matmul %4, %5, %cst {dimension_numbers = #tpu.dot_dimension_numbers<[1], [0], [0], [1], [0, 0, 1, 1], [], []>} : vector<16x128xbf16>, vector<128x128xbf16>, vector<16x128xf32> -> vector<16x128xf32>
    %7 = arith.addf %3, %6 : vector<16x128xf32>
    %c0_6 = arith.constant 0 : index
    %c0_7 = arith.constant 0 : index
    %8 = vector.load %arg6[%c0_6, %c0_7] : memref<16x128xf32, #tpu.memory_space<vmem>>, vector<16x128xf32>
    tpu.vector_store %arg6[%c0_6, %c0_7], %7 {strides = array<i32>} : memref<16x128xf32, #tpu.memory_space<vmem>>, vector<16x128xf32>,
    return
  }
  func.func @transform_0(%arg0: i32, %arg1: i32, %arg2: i32) -> (i32, i32) {
    %c0_i32 = arith.constant 0 : i32
    return %arg0, %arg2 : i32, i32
  }
  func.func @transform_1(%arg0: i32, %arg1: i32, %arg2: i32) -> (i32, i32) {
    %c0_i32 = arith.constant 0 : i32
    return %arg2, %arg1 : i32, i32
  }
  func.func @transform_2(%arg0: i32, %arg1: i32, %arg2: i32) -> (i32, i32) {
    %c0_i32 = arith.constant 0 : i32
    %c0_i32_0 = arith.constant 0 : i32
    return %c0_i32, %arg1 : i32, i32
  }
  func.func @transform_3(%arg0: i32, %arg1: i32, %arg2: i32) -> (i32, i32) {
    %c0_i32 = arith.constant 0 : i32
    return %arg0, %arg1 : i32, i32
  }
}

</mosaic_0001>

<bundles_post_ra>
// kernel: tpu_custom_call.1
= control target key start
LH: loop header
LB: loop body
LE: loop exit
PB: predicated region body
PF: predicated region fallthrough
CT: control target
= control target key end

     0   :  { %8 = vsyncpa [#allocation3], 0  ;;  %s358_s0 = inlined_call_operand.hbm [shape: bf16[16,128], index: 0, kind: input, shape index: {}]   ;;  %s359_s1 = inlined_call_operand.hbm [shape: bf16[128,128], index: 1, kind: input, shape index: {}]   ;;  %s360_s2 = inlined_call_operand.vmem [shape: f32[1,128], index: 2, kind: input, shape index: {}]   ;;  %s361_s3 = inlined_call_operand.hbm [shape: f32[16,128], index: 3, kind: output, shape index: {}]  }
   0x1   :  { %9 = vsyncpa [#allocation6], 0 }
   0x2   :  { %10 = vsyncpa [#allocation4], 0  ;;  %s317_s12 = smov [#allocation2]  }
   0x3   :  { %s16_s13 = sshll.u32 %s317_s12, 4  ;;  %s17_s13 = int_to_ptr.vmem [resolvable:$true] %s16_s13 }
   0x4   :  { %s259_s14 = scalar_lea.vmem %s17_s13, 128  ;;  %p264_p1 = scmp.lt.s32.totalorder %s17_s13, %s17_s13 }
   0x5   :  { %p260_p0 = scmp.ne.s32.totalorder %s17_s13, %s259_s14  ;;  %p265_p2 = scmp.lt.s32.totalorder %s259_s14, %s259_s14 }
   0x7   :  { %p266_p3 = por %p265_p2, %p264_p1 }
   0x9   :  { %p267_p4 = pnand %p266_p3, %p260_p0 }
   0xb   :  { %270 = shalt.err (!%p267_p4)
}
   0xc   :  { %s318_s15 = smov 64   ;;  %s319_s16 = smov 4  }
   0xd   :  { %22 = dma.hbm_to_vmem [thread:$0]  %s358_s0, 128, %s17_s13, [#allocation3], %s318_s15, %s318_s15, %s319_s16  }
   0xe   :  { %s320_s19 = smov [#allocation5]  }
   0xf   :  { %s28_s20 = sshll.u32 %s320_s19, 4  ;;  %s29_s20 = int_to_ptr.vmem [resolvable:$true] %s28_s20 }
  0x10   :  { %s279_s21 = scalar_lea.vmem %s29_s20, 1024  ;;  %p284_p6 = scmp.lt.s32.totalorder %s29_s20, %s29_s20 }
  0x11   :  { %p280_p5 = scmp.ne.s32.totalorder %s29_s20, %s279_s21  ;;  %p285_p7 = scmp.lt.s32.totalorder %s279_s21, %s279_s21 }
  0x13   :  { %p286_p8 = por %p285_p7, %p284_p6 }
  0x15   :  { %p287_p9 = pnand %p286_p8, %p280_p5 }
  0x17   :  { %290 = shalt.err (!%p287_p9)
}
  0x18   :  { %34 = dma.hbm_to_vmem [thread:$0]  %s359_s1, 1024, %s29_s20, [#allocation6], %s318_s15, %s318_s15, %s319_s16  }
  0x19   :  { %311 = dma.done.wait [#allocation3], 128  }
  0x1a   :  { %312 = vsyncadd [#allocation3], 4294967168 }
  0x1b   :  { %313 = dma.done.wait [#allocation6], 1024  }
  0x1c   :  { %314 = vsyncadd [#allocation6], 4294966272  ;;  %v321_v0 = vmov 0.0   ;;  %vm322_vm0 = vmmov 0   ;;  %v242_v1 = vld [vmem:[#allocation5 + $0x38] sm:$0xff]   ;;  %v243_v2 = vld [vmem:[#allocation5 + $0x30] sm:$0xff]  }
  0x1d   :  { %213 = vmatprep.subr.bf16.mxu0 %v321_v0  ;;  %229 = vmatprep.mubr.msk.bf16.mxu0 %vm322_vm0, %v321_v0  ;;  %v244_v3 = vld [vmem:[#allocation5 + $0x28] sm:$0xff]   ;;  %v245_v4 = vld [vmem:[#allocation5 + $0x20] sm:$0xff]   ;;  %v246_v5 = vld [vmem:[#allocation5 + $0x18] sm:$0xff]   ;;  %s323_s24 = smov [#allocation7]  }
  0x1e   :  { %214 = vmatpush3.bf16.msra.mxu0 %v242_v1  ;;  %v247_v6 = vld [vmem:[#allocation5 + $0x10] sm:$0xff]   ;;  %v248_v7 = vld [vmem:[#allocation5 + $0x8] sm:$0xff]   ;;  %v249_v8 = vld [vmem:[#allocation5] sm:$0xff]   ;;  %s181_s25 = sshll.u32 %s323_s24, 4  ;;  %s182_s25 = int_to_ptr.vmem [resolvable:$true] %s181_s25 }
  0x1f   :  { %215 = vmatprep.subr.bf16.mxu0 %v321_v0  ;;  %v250_v9 = vld [vmem:[#allocation2] sm:$0xff]   ;;  %s291_s26 = scalar_lea.vmem %s182_s25, 256  ;;  %p296_p11 = scmp.lt.s32.totalorder %s182_s25, %s182_s25 }
  0x20   :  { %v194_v10 = vld [vmem:[%s360_s2] ss:$0 sm:$0xff]  ;;  %p292_p10 = scmp.ne.s32.totalorder %s182_s25, %s291_s26  ;;  %p297_p12 = scmp.lt.s32.totalorder %s291_s26, %s291_s26 }
  0x22   :  { %216 = vmatpush3.bf16.msra.mxu0 %v243_v2  ;;  %p298_p13 = por %p297_p12, %p296_p11 }
  0x23   :  { %217 = vmatprep.subr.bf16.mxu0 %v321_v0 }
  0x24   :  { %p299_p0 = pnand %p298_p13, %p292_p10 }
  0x26   :  { %218 = vmatpush3.bf16.msra.mxu0 %v244_v3 }
  0x27   :  { %219 = vmatprep.subr.bf16.mxu0 %v321_v0 }
  0x2a   :  { %220 = vmatpush3.bf16.msra.mxu0 %v245_v4 }
  0x2b   :  { %221 = vmatprep.subr.bf16.mxu0 %v321_v0 }
  0x2e   :  { %222 = vmatpush3.bf16.msra.mxu0 %v246_v5 }
  0x2f   :  { %223 = vmatprep.subr.bf16.mxu0 %v321_v0 }
  0x32   :  { %224 = vmatpush3.bf16.msra.mxu0 %v247_v6 }
  0x33   :  { %225 = vmatprep.subr.bf16.mxu0 %v321_v0 }
  0x36   :  { %226 = vmatpush3.bf16.msra.mxu0 %v248_v7 }
  0x37   :  { %227 = vmatprep.subr.bf16.mxu0 %v321_v0 }
  0x3a   :  { %228 = vmatpush3.bf16.msra.mxu0 %v249_v8 }
  0x3d   :  { %230 = vmatmul.mubr.bf16.vlgmr.msra.gmra.mxu0 %v250_v9 }
  0xfd   :  { %v165_v11 = vpop.f32.mrf.mxu0 }
  0xfe   :  { %v172_v12 = vadd.f32 %v194_v10, %v165_v11 }
  0xff   :  { %v231_v13 = vpop.f32.mrf.mxu0 }
 0x100   :  { %174 = vst [vmem:[#allocation7] sm:$0xff] %v172_v12 }
 0x101   :  { %v168_v14 = vpop.f32.mrf.mxu0 }
 0x102   :  { %v173_v15 = vadd.f32 %v194_v10, %v168_v14 }
 0x103   :  { %v232_v16 = vpop.f32.mrf.mxu0 }
 0x104   :  { %175 = vst [vmem:[#allocation7 + $0x8] sm:$0xff] %v173_v15 }
 0x105   :  { %302 = shalt.err (!%p299_p0)
}
 0x106   :  { %s324_s27 = smov 128   ;;  %s325_s2 = smov 8  }
 0x107   :  { %187 = dma.vmem_to_hbm [thread:$0]  %s182_s25, 256, %s361_s3, [#allocation4], %s324_s27, %s324_s27, %s325_s2  }
 0x108   :  { %315 = dma.done.wait [#allocation4], 256  }
 0x109   :  { %316 = vsyncadd [#allocation4], 4294967040 }
 0x10a   :  { %191 = vsyncpa [#allocation3], 1 }
 0x10b   :  { %192 = vsyncpa [#allocation6], 1 }
 0x10c   :  { %193 = vsyncpa [#allocation4], 1 }

</bundles_post_ra>
